<compile_context>
chip_gen: v5e
topology: v5e:2x2
jax: 0.10.0
libtpu: 0.0.40
codegen_flags: <defaults>
</compile_context>

<pallas_src>
import math
from functools import reduce
from operator import mul

import jax
import jax.numpy as jnp
from jax import lax
from jax.experimental import pallas as pl
from jax.experimental.pallas import tpu as pltpu

LN_EPS = 1e-5
MASK_NEG = -1e30


def _round_up(x, m):
    return ((x + m - 1) // m) * m


def _cdiv(a, b):
    return (a + b - 1) // b


# --------------------------------------------------------------------------
# Kernel A: per-class K / V / mask-bias precompute (batch-invariant path).
#   K    = LayerNorm(text) @ Wk + bk   (bf16)
#   V    = LayerNorm(text)             (bf16)
#   bias = where(mask > 0, 0, MASK_NEG) (f32)
# --------------------------------------------------------------------------
def _kv_kernel(text_ref, mask_ref, gamma_ref, beta_ref, wk_ref, bk_ref,
               k_ref, v_ref, bias_ref):
    gamma = gamma_ref[...].astype(jnp.float32)
    beta = beta_ref[...].astype(jnp.float32)
    t = text_ref[...].astype(jnp.float32)                       # (T, C)
    mean = jnp.mean(t, axis=-1, keepdims=True)
    var = jnp.mean(jnp.square(t - mean), axis=-1, keepdims=True)
    tn = (t - mean) * lax.rsqrt(var + LN_EPS) * gamma + beta
    k = jnp.dot(tn.astype(jnp.bfloat16), wk_ref[...],
                preferred_element_type=jnp.float32)
    k_ref[...] = (k + bk_ref[...].astype(jnp.float32)).astype(jnp.bfloat16)
    v_ref[...] = tn.astype(jnp.bfloat16)
    bias_ref[...] = jnp.where(mask_ref[...].astype(jnp.float32) > 0.0,
                              0.0, MASK_NEG)


# --------------------------------------------------------------------------
# Kernel B: fused LayerNorm + cross-attention.
# Grid = (batch_tiles, num_classes): Q computed once per batch tile (class 0)
# and held in bf16 VMEM scratch; per class step only the small (TB,T)/(TB,C)
# attention matmuls run, streaming the precomputed bf16 K/V blocks.
# --------------------------------------------------------------------------
def _attn_kernel(img_ref, k_ref, v_ref, bias_ref, gamma_ref, beta_ref,
                 wq_ref, bq_ref, o_ref, q_scr):
    @pl.when(pl.program_id(1) == 0)
    def _():
        x = img_ref[...].astype(jnp.float32)                    # (TB, C)
        mean = jnp.mean(x, axis=-1, keepdims=True)
        var = jnp.mean(jnp.square(x - mean), axis=-1, keepdims=True)
        xn = ((x - mean) * lax.rsqrt(var + LN_EPS)
              * gamma_ref[...].astype(jnp.float32)
              + beta_ref[...].astype(jnp.float32))
        q = jnp.dot(xn.astype(jnp.bfloat16), wq_ref[...],        # scale folded in
                    preferred_element_type=jnp.float32)
        q_scr[...] = (q + bq_ref[...].astype(jnp.float32)).astype(jnp.bfloat16)

    # (TB, C) x (T, C) -> (TB, T): contraction over C on the MXU, no .T / cast.
    attn = lax.dot_general(q_scr[...], k_ref[...],
                           dimension_numbers=(((1,), (1,)), ((), ())),
                           preferred_element_type=jnp.float32)
    attn = attn + bias_ref[...]                                  # (1, T) bcast add
    attn = attn - jnp.max(attn, axis=-1, keepdims=True)
    e = jnp.exp(attn)
    p = e * pl.reciprocal(jnp.sum(e, axis=-1, keepdims=True), approx=True)
    out = jnp.dot(p.astype(jnp.bfloat16), v_ref[...],
                  preferred_element_type=jnp.float32)            # (TB, C)
    o_ref[...] = out.astype(o_ref.dtype)


def attention_pooling(img, text, mask_text, params, *, tb=512, out_dtype=None):
    """Fused LayerNorm + CrossAttention pooling.

    img       : (B, C)               image [CLS] token per batch element
    text      : (num_classes, T, C)  text embeddings per class
    mask_text : (num_classes, 1, T)  validity mask for the text tokens
    returns   : (B, num_classes, C)
    """
    B, C = img.shape
    num_classes, T, _ = text.shape
    gamma, beta, wq, bq, wk, bk = params
    out_dtype = img.dtype if out_dtype is None else out_dtype

    # Fold the C^-0.5 attention scale into Wq / bq on the host (one-time C^2
    # op, removes a per-activation multiply in the kernel); MXU operands bf16.
    scale = float(C) ** -0.5
    wq_b = (wq.astype(jnp.float32) * scale).astype(jnp.bfloat16)
    bq_s = bq.astype(jnp.float32) * scale
    wk_b = wk.astype(jnp.bfloat16)

    # ---- per-class K / V / bias, computed exactly once ----------------------
    k_all, v_all, bias_all = pl.pallas_call(
        _kv_kernel,
        out_shape=(jax.ShapeDtypeStruct((num_classes, T, C), jnp.bfloat16),
                   jax.ShapeDtypeStruct((num_classes, T, C), jnp.bfloat16),
                   jax.ShapeDtypeStruct((num_classes, 1, T), jnp.float32)),
        grid=(num_classes,),
        in_specs=[
            pl.BlockSpec((None, T, C), lambda c: (c, 0, 0)),     # text (class)
            pl.BlockSpec((None, 1, T), lambda c: (c, 0, 0)),     # mask (class)
            pl.BlockSpec((1, C), lambda c: (0, 0)),              # LN gamma
            pl.BlockSpec((1, C), lambda c: (0, 0)),              # LN beta
            pl.BlockSpec((C, C), lambda c: (0, 0)),              # Wk (bf16)
            pl.BlockSpec((1, C), lambda c: (0, 0)),              # bk
        ],
        out_specs=(pl.BlockSpec((None, T, C), lambda c: (c, 0, 0)),
                   pl.BlockSpec((None, T, C), lambda c: (c, 0, 0)),
                   pl.BlockSpec((None, 1, T), lambda c: (c, 0, 0))),
        compiler_params=pltpu.CompilerParams(
            dimension_semantics=("parallel",)),
    )(text, mask_text, gamma, beta, wk_b, bk)

    # ---- batch-tile sizing: minimal padding, capped by a VMEM budget --------
    try:
        vmem_cap = int(pltpu.get_tpu_info().vmem_capacity_bytes)
    except Exception:
        vmem_cap = 128 * 1024 * 1024
    # ~96 MiB on v5e/v6e (128 MiB VMEM), ~48 MiB on v7x (64 MiB VMEM).
    vmem_limit = min(96 * 1024 * 1024, (vmem_cap * 3) // 4)
    budget = (vmem_limit * 3) // 5
    out_sz = jnp.dtype(out_dtype).itemsize
    fixed = 8 * T * C + 4 * C * C + 8 * 4 * C + (1 << 20)        # K/V, Wq, vecs, slack
    per_row = C * (2 * 4 + 2 * out_sz + 2)                       # img, out (x2), q_scr
    tb_cap = max(8, ((budget - fixed) // per_row) // 8 * 8)

    tb_eff = _round_up(_cdiv(B, _cdiv(B, tb)), 8)                # minimize padding
    tb_eff = min(tb_eff, tb_cap)
    n_bt = _cdiv(B, tb_eff)
    b_pad = n_bt * tb_eff
    if b_pad != B:
        img = jnp.pad(img, ((0, b_pad - B), (0, 0)))
    # TODO(synk): on v7x (2 TCs) additionally cap tb so n_bt >= 2 for large B,
    # and mark the grid-invariant weight inputs pipeline_mode=pl.Buffered(1).

    in_specs = [
        pl.BlockSpec((tb_eff, C), lambda b, c: (b, 0)),          # img rows
        pl.BlockSpec((None, T, C), lambda b, c: (c, 0, 0)),      # K  (bf16, class)
        pl.BlockSpec((None, T, C), lambda b, c: (c, 0, 0)),      # V  (bf16, class)
        pl.BlockSpec((None, 1, T), lambda b, c: (c, 0, 0)),      # mask bias
        pl.BlockSpec((1, C), lambda b, c: (0, 0)),               # LN gamma
        pl.BlockSpec((1, C), lambda b, c: (0, 0)),               # LN beta
        pl.BlockSpec((C, C), lambda b, c: (0, 0)),               # Wq (bf16, scaled)
        pl.BlockSpec((1, C), lambda b, c: (0, 0)),               # bq (scaled)
    ]
    scratch = [pltpu.VMEM((tb_eff, C), jnp.bfloat16)]            # resident Q tile
    cparams = pltpu.CompilerParams(
        dimension_semantics=("parallel", "arbitrary"),
        vmem_limit_bytes=vmem_limit)
    args = (img, k_all, v_all, bias_all, gamma, beta, wq_b, bq_s)

    if C % 128 == 0:
        # Lane-dense (TB, C) stores straight into a (B, num_classes*C) slab;
        # the caller layout (B, num_classes, C) is a free reshape -> no
        # post-kernel transpose / extra HBM round trip.
        out = pl.pallas_call(
            _attn_kernel,
            out_shape=jax.ShapeDtypeStruct((b_pad, num_classes * C), out_dtype),
            grid=(n_bt, num_classes),
            in_specs=in_specs,
            out_specs=pl.BlockSpec((tb_eff, C), lambda b, c: (b, c)),
            scratch_shapes=scratch,
            compiler_params=cparams,
        )(*args)
        return out[:B].reshape(B, num_classes, C)

    # Fallback for non-lane-aligned C: class-major output + host transpose.
    out = pl.pallas_call(
        _attn_kernel,
        out_shape=jax.ShapeDtypeStruct((num_classes, b_pad, C), out_dtype),
        grid=(n_bt, num_classes),
        in_specs=in_specs,
        out_specs=pl.BlockSpec((None, tb_eff, C), lambda b, c: (c, b, 0)),
        scratch_shapes=scratch,
        compiler_params=cparams,
    )(*args)
    return jnp.transpose(out[:, :B, :], (1, 0, 2))


def pooling_forward(img_token, text_embeddings, attn_mask, params, *, tb=512):
    """AttentionPooling.forward glue (pure shape plumbing, no tiled concat).

    img_token       : (B, 1, 1, C)
    text_embeddings : (1, num_classes, T, C)
    attn_mask       : (1, num_classes, 1 + T)
    """
    B, C = img_token.shape[0], img_token.shape[-1]
    num_classes, T = text_embeddings.shape[1], text_embeddings.shape[2]
    img = img_token.reshape(B, C)
    text = text_embeddings.reshape(num_classes, T, C)
    mask_text = attn_mask.reshape(num_classes, 1 + T)[:, 1:].reshape(
        num_classes, 1, T)
    # TODO(synk): the reference AttentionPooling.forward applies `[...][0]` +
    # rearrange, which is shape-inconsistent for batched output; we return the
    # full batched pool (B, num_classes, C) (the intended semantics).
    return attention_pooling(img, text, mask_text, params, tb=tb)


# --------------------------------------------------------------------------
# Pure-JAX reference (mirrors the PyTorch math) for correctness checking.
# --------------------------------------------------------------------------
def _ref_pooling_forward(img_token, text_embeddings, attn_mask, params):
    gamma, beta, wq, bq, wk, bk = params
    B = img_token.shape[0]
    num_classes = text_embeddings.shape[1]
    x = jnp.concatenate([jnp.tile(img_token, (1, num_classes, 1, 1)),
                         jnp.tile(text_embeddings, (B, 1, 1, 1))], axis=-2)
    N, d = x.shape[-2], x.shape[-1]
    x = x.reshape(B * num_classes, N, d).astype(jnp.float32)
    mask = jnp.tile(attn_mask, (B, 1, 1)).reshape(B * num_classes, N)
    mean = x.mean(-1, keepdims=True)
    var = jnp.square(x - mean).mean(-1, keepdims=True)
    xn = (x - mean) / jnp.sqrt(var + LN_EPS) * gamma + beta
    q = (xn[:, 0:1, :] @ wq + bq) * (float(d) ** -0.5)
    k = xn[:, 1:, :] @ wk + bk
    attn = q @ jnp.swapaxes(k, -1, -2)
    attn = jnp.where(mask[:, None, 1:] > 0, attn, MASK_NEG)
    attn = jax.nn.softmax(attn, axis=-1)
    out = attn @ xn[:, 1:, :]
    return out.reshape(B, num_classes, d)


# --------------------------------------------------------------------------
# Module port with deterministic synthetic parameter initialization.
# --------------------------------------------------------------------------
class VisualPromptLearner:
    def __init__(self, num_prompts, prompt_dim, in_dim, patch_size=(16, 16),
                 deep=True, deep_layers=12, dtype=jnp.float32, key=None):
        if key is None:
            key = jax.random.PRNGKey(0)
        self.num_prompts = num_prompts
        self.prompt_dim = prompt_dim
        self.in_dim = in_dim
        self.deep = deep
        self.deep_layers = deep_layers
        self.dtype = dtype

        k_prompt, k_pool = jax.random.split(key)
        # init_prompt: uniform(-val, val), val = sqrt(6 / (3*prod(patch)+dim))
        val = math.sqrt(6.0 / float(3 * reduce(mul, patch_size, 1) + prompt_dim))
        self.prompt_embeddings = jax.random.uniform(
            k_prompt, (1, num_prompts, prompt_dim), dtype=dtype,
            minval=-val, maxval=val)
        if deep:
            self.deep_prompt_embeddings = jnp.zeros(
                (deep_layers - 1, num_prompts, prompt_dim), dtype=dtype)
        else:
            self.deep_prompt_embeddings = None

        # num_prompts + 1 AttentionPooling heads (LayerNorm + CrossAttention).
        # Linear weights trunc_normal(std=0.02), biases zero (init_weights).
        # TODO(synk): stack the heads along a leading weight axis and serve all
        # of them with one pallas_call (extra innermost head grid axis) so the
        # img/text DMAs are amortized across heads.
        self.pooling_params = []
        for kk in jax.random.split(k_pool, num_prompts + 1):
            kq, kkk = jax.random.split(kk)
            gamma = jnp.ones((1, in_dim), dtype)
            beta = jnp.zeros((1, in_dim), dtype)
            wq = (0.02 * jax.random.truncated_normal(
                kq, -2.0, 2.0, (in_dim, in_dim))).astype(dtype)
            bq = jnp.zeros((1, in_dim), dtype)
            wk = (0.02 * jax.random.truncated_normal(
                kkk, -2.0, 2.0, (in_dim, in_dim))).astype(dtype)
            bk = jnp.zeros((1, in_dim), dtype)
            self.pooling_params.append((gamma, beta, wq, bq, wk, bk))

    def __call__(self):
        # forward(): (prompt_embeddings, deep_prompt_embeddings) -- pure
        # parameter return, no pallas_call round trip.
        return self.prompt_embeddings, self.deep_prompt_embeddings


if __name__ == "__main__":
    root = jax.random.PRNGKey(0)
    k_learner, k_img, k_text, k_mask = jax.random.split(root, 4)

    num_prompts, prompt_dim, in_dim = 4, 128, 128
    learner = VisualPromptLearner(num_prompts, prompt_dim, in_dim, key=k_learner)

    # VisualPromptLearner.forward()
    prompts, deep_prompts = learner()
    jax.block_until_ready((prompts, deep_prompts))
    assert prompts.shape == (1, num_prompts, prompt_dim)
    assert deep_prompts.shape == (learner.deep_layers - 1, num_prompts,
                                  prompt_dim)
    assert bool(jnp.all(deep_prompts == 0.0))

    # Exercise one AttentionPooling head (the fused Pallas kernels).
    B, num_classes, n_text = 2, 3, 7
    img_token = jax.random.normal(k_img, (B, 1, 1, in_dim), jnp.float32)
    text_embeddings = jax.random.normal(
        k_text, (1, num_classes, n_text, in_dim), jnp.float32)
    attn_mask = (jax.random.uniform(k_mask, (1, num_classes, 1 + n_text)) > 0.3
                 ).astype(jnp.float32)
    attn_mask = attn_mask.at[:, :, 0].set(1.0)   # img token always valid
    attn_mask = attn_mask.at[:, :, 1].set(1.0)   # keep >=1 text token unmasked

    params = learner.pooling_params[0]
    pooled = pooling_forward(img_token, text_embeddings, attn_mask, params)
    jax.block_until_ready(pooled)
    assert pooled.shape == (B, num_classes, in_dim)
    assert bool(jnp.all(jnp.isfinite(pooled)))

    # Numerical check against a pure-JAX (f32) reference of the PyTorch math;
    # tolerance accounts for bf16 MXU operands + approx reciprocal softmax.
    ref = _ref_pooling_forward(img_token, text_embeddings, attn_mask, params)
    max_err = float(jnp.max(jnp.abs(pooled - ref)))
    assert bool(jnp.allclose(pooled, ref, atol=5e-2, rtol=5e-2)), max_err

    print("KERNEL_OK")
</pallas_src>

<mosaic_0001>
module attributes {stable_mosaic.version = 11 : i64} {
  func.func @_kv_kernel(%arg0: i32, %arg1: memref<1x7x128xf32, #tpu.memory_space<vmem>>, %arg2: memref<1x1x7xf32, #tpu.memory_space<vmem>>, %arg3: memref<1x128xf32, #tpu.memory_space<vmem>>, %arg4: memref<1x128xf32, #tpu.memory_space<vmem>>, %arg5: memref<128x128xbf16, #tpu.memory_space<vmem>>, %arg6: memref<1x128xf32, #tpu.memory_space<vmem>>, %arg7: memref<1x7x128xbf16, #tpu.memory_space<vmem>>, %arg8: memref<1x7x128xbf16, #tpu.memory_space<vmem>>, %arg9: memref<1x1x7xf32, #tpu.memory_space<vmem>>) attributes {dimension_semantics = [#tpu.dimension_semantics<parallel>], iteration_bounds = array<i64: 3>, scalar_prefetch = 0 : i64, scratch_operands = 0 : i64, tpu.core_type = #tpu.core_type<tc>, window_params = [{transform_indices = @transform_0, window_bounds = array<i64: 1, 7, 128>}, {transform_indices = @transform_1, window_bounds = array<i64: 1, 1, 7>}, {pipeline_mode = #tpu.pipeline_mode<synchronous>, transform_indices = @transform_2, window_bounds = array<i64: 1, 128>}, {pipeline_mode = #tpu.pipeline_mode<synchronous>, transform_indices = @transform_3, window_bounds = array<i64: 1, 128>}, {pipeline_mode = #tpu.pipeline_mode<synchronous>, transform_indices = @transform_4, window_bounds = array<i64: 128, 128>}, {pipeline_mode = #tpu.pipeline_mode<synchronous>, transform_indices = @transform_5, window_bounds = array<i64: 1, 128>}, {transform_indices = @transform_6, window_bounds = array<i64: 1, 7, 128>}, {transform_indices = @transform_7, window_bounds = array<i64: 1, 7, 128>}, {transform_indices = @transform_8, window_bounds = array<i64: 1, 1, 7>}]} {
    %c0 = arith.constant 0 : index
    %c0_0 = arith.constant 0 : index
    %0 = vector.load %arg3[%c0, %c0_0] : memref<1x128xf32, #tpu.memory_space<vmem>>, vector<1x128xf32>
    %c0_1 = arith.constant 0 : index
    %c0_2 = arith.constant 0 : index
    %1 = vector.load %arg4[%c0_1, %c0_2] : memref<1x128xf32, #tpu.memory_space<vmem>>, vector<1x128xf32>
    %c0_3 = arith.constant 0 : index
    %c0_4 = arith.constant 0 : index
    %c0_5 = arith.constant 0 : index
    %2 = vector.load %arg1[%c0_3, %c0_4, %c0_5] : memref<1x7x128xf32, #tpu.memory_space<vmem>>, vector<1x7x128xf32>
    %3 = vector.shape_cast %2 : vector<1x7x128xf32> to vector<7x128xf32>
    %cst = arith.constant dense<0.000000e+00> : vector<7xf32>
    %4 = vector.multi_reduction <add>, %3, %cst [1] : vector<7x128xf32> to vector<7xf32>
    %5 = vector.shape_cast %4 : vector<7xf32> to vector<7x1xf32>
    %cst_6 = arith.constant 1.280000e+02 : f32
    %6 = vector.broadcast %cst_6 : f32 to vector<7x1xf32>
    %7 = arith.divf %5, %6 : vector<7x1xf32>
    %8 = vector.broadcast %7 : vector<7x1xf32> to vector<7x128xf32>
    %9 = arith.subf %3, %8 : vector<7x128xf32>
    %10 = arith.mulf %9, %9 : vector<7x128xf32>
    %cst_7 = arith.constant dense<0.000000e+00> : vector<7xf32>
    %11 = vector.multi_reduction <add>, %10, %cst_7 [1] : vector<7x128xf32> to vector<7xf32>
    %12 = vector.shape_cast %11 : vector<7xf32> to vector<7x1xf32>
    %cst_8 = arith.constant 1.280000e+02 : f32
    %13 = vector.broadcast %cst_8 : f32 to vector<7x1xf32>
    %14 = arith.divf %12, %13 : vector<7x1xf32>
    %15 = vector.broadcast %7 : vector<7x1xf32> to vector<7x128xf32>
    %16 = arith.subf %3, %15 : vector<7x128xf32>
    %cst_9 = arith.constant 9.99999974E-6 : f32
    %17 = vector.broadcast %cst_9 : f32 to vector<7x1xf32>
    %18 = arith.addf %14, %17 : vector<7x1xf32>
    %19 = math.rsqrt %18 : vector<7x1xf32>
    %20 = vector.broadcast %19 : vector<7x1xf32> to vector<7x128xf32>
    %21 = arith.mulf %16, %20 : vector<7x128xf32>
    %22 = vector.broadcast %0 : vector<1x128xf32> to vector<7x128xf32>
    %23 = arith.mulf %21, %22 : vector<7x128xf32>
    %24 = vector.broadcast %1 : vector<1x128xf32> to vector<7x128xf32>
    %25 = arith.addf %23, %24 : vector<7x128xf32>
    %26 = arith.truncf %25 : vector<7x128xf32> to vector<7x128xbf16>
    %c0_10 = arith.constant 0 : index
    %c0_11 = arith.constant 0 : index
    %27 = vector.load %arg5[%c0_10, %c0_11] : memref<128x128xbf16, #tpu.memory_space<vmem>>, vector<128x128xbf16>
    %cst_12 = arith.constant dense<0.000000e+00> : vector<7x128xf32>
    %28 = tpu.matmul %26, %27, %cst_12 {dimension_numbers = #tpu.dot_dimension_numbers<[1], [0], [0], [1], [0, 0, 1, 1], [], []>} : vector<7x128xbf16>, vector<128x128xbf16>, vector<7x128xf32> -> vector<7x128xf32>
    %c0_13 = arith.constant 0 : index
    %c0_14 = arith.constant 0 : index
    %29 = vector.load %arg6[%c0_13, %c0_14] : memref<1x128xf32, #tpu.memory_space<vmem>>, vector<1x128xf32>
    %30 = vector.broadcast %29 : vector<1x128xf32> to vector<7x128xf32>
    %31 = arith.addf %28, %30 : vector<7x128xf32>
    %32 = arith.truncf %31 : vector<7x128xf32> to vector<7x128xbf16>
    %c0_15 = arith.constant 0 : index
    %c0_16 = arith.constant 0 : index
    %c0_17 = arith.constant 0 : index
    %33 = vector.load %arg7[%c0_15, %c0_16, %c0_17] : memref<1x7x128xbf16, #tpu.memory_space<vmem>>, vector<1x7x128xbf16>
    %34 = vector.shape_cast %33 : vector<1x7x128xbf16> to vector<7x128xbf16>
    %35 = vector.shape_cast %32 : vector<7x128xbf16> to vector<1x7x128xbf16>
    tpu.vector_store %arg7[%c0_15, %c0_16, %c0_17], %35 {strides = array<i32>} : memref<1x7x128xbf16, #tpu.memory_space<vmem>>, vector<1x7x128xbf16>,
    %36 = arith.truncf %25 : vector<7x128xf32> to vector<7x128xbf16>
    %c0_18 = arith.constant 0 : index
    %c0_19 = arith.constant 0 : index
    %c0_20 = arith.constant 0 : index
    %37 = vector.load %arg8[%c0_18, %c0_19, %c0_20] : memref<1x7x128xbf16, #tpu.memory_space<vmem>>, vector<1x7x128xbf16>
    %38 = vector.shape_cast %37 : vector<1x7x128xbf16> to vector<7x128xbf16>
    %39 = vector.shape_cast %36 : vector<7x128xbf16> to vector<1x7x128xbf16>
    tpu.vector_store %arg8[%c0_18, %c0_19, %c0_20], %39 {strides = array<i32>} : memref<1x7x128xbf16, #tpu.memory_space<vmem>>, vector<1x7x128xbf16>,
    %c0_21 = arith.constant 0 : index
    %c0_22 = arith.constant 0 : index
    %c0_23 = arith.constant 0 : index
    %40 = vector.load %arg2[%c0_21, %c0_22, %c0_23] : memref<1x1x7xf32, #tpu.memory_space<vmem>>, vector<1x1x7xf32>
    %41 = vector.shape_cast %40 : vector<1x1x7xf32> to vector<1x7xf32>
    %cst_24 = arith.constant 0.000000e+00 : f32
    %42 = vector.broadcast %cst_24 : f32 to vector<1x7xf32>
    %43 = arith.cmpf ogt, %41, %42 : vector<1x7xf32>
    %cst_25 = arith.constant 0.000000e+00 : f32
    %cst_26 = arith.constant -1.000000e+30 : f32
    %44 = vector.broadcast %cst_25 : f32 to vector<1x7xf32>
    %45 = vector.broadcast %cst_26 : f32 to vector<1x7xf32>
    %46 = arith.select %43, %44, %45 : vector<1x7xi1>, vector<1x7xf32>
    %c0_27 = arith.constant 0 : index
    %c0_28 = arith.constant 0 : index
    %c0_29 = arith.constant 0 : index
    %47 = vector.load %arg9[%c0_27, %c0_28, %c0_29] : memref<1x1x7xf32, #tpu.memory_space<vmem>>, vector<1x1x7xf32>
    %48 = vector.shape_cast %47 : vector<1x1x7xf32> to vector<1x7xf32>
    %49 = vector.shape_cast %46 : vector<1x7xf32> to vector<1x1x7xf32>
    tpu.vector_store %arg9[%c0_27, %c0_28, %c0_29], %49 {strides = array<i32>} : memref<1x1x7xf32, #tpu.memory_space<vmem>>, vector<1x1x7xf32>,
    return
  }
  func.func @transform_0(%arg0: i32) -> (i32, i32, i32) {
    %c0_i32 = arith.constant 0 : i32
    %c0_i32_0 = arith.constant 0 : i32
    %c0_i32_1 = arith.constant 0 : i32
    return %arg0, %c0_i32, %c0_i32_0 : i32, i32, i32
  }
  func.func @transform_1(%arg0: i32) -> (i32, i32, i32) {
    %c0_i32 = arith.constant 0 : i32
    %c0_i32_0 = arith.constant 0 : i32
    %c0_i32_1 = arith.constant 0 : i32
    return %arg0, %c0_i32, %c0_i32_0 : i32, i32, i32
  }
  func.func @transform_2(%arg0: i32) -> (i32, i32) {
    %c0_i32 = arith.constant 0 : i32
    %c0_i32_0 = arith.constant 0 : i32
    %c0_i32_1 = arith.constant 0 : i32
    return %c0_i32, %c0_i32_0 : i32, i32
  }
  func.func @transform_3(%arg0: i32) -> (i32, i32) {
    %c0_i32 = arith.constant 0 : i32
    %c0_i32_0 = arith.constant 0 : i32
    %c0_i32_1 = arith.constant 0 : i32
    return %c0_i32, %c0_i32_0 : i32, i32
  }
  func.func @transform_4(%arg0: i32) -> (i32, i32) {
    %c0_i32 = arith.constant 0 : i32
    %c0_i32_0 = arith.constant 0 : i32
    %c0_i32_1 = arith.constant 0 : i32
    return %c0_i32, %c0_i32_0 : i32, i32
  }
  func.func @transform_5(%arg0: i32) -> (i32, i32) {
    %c0_i32 = arith.constant 0 : i32
    %c0_i32_0 = arith.constant 0 : i32
    %c0_i32_1 = arith.constant 0 : i32
    return %c0_i32, %c0_i32_0 : i32, i32
  }
  func.func @transform_6(%arg0: i32) -> (i32, i32, i32) {
    %c0_i32 = arith.constant 0 : i32
    %c0_i32_0 = arith.constant 0 : i32
    %c0_i32_1 = arith.constant 0 : i32
    return %arg0, %c0_i32, %c0_i32_0 : i32, i32, i32
  }
  func.func @transform_7(%arg0: i32) -> (i32, i32, i32) {
    %c0_i32 = arith.constant 0 : i32
    %c0_i32_0 = arith.constant 0 : i32
    %c0_i32_1 = arith.constant 0 : i32
    return %arg0, %c0_i32, %c0_i32_0 : i32, i32, i32
  }
  func.func @transform_8(%arg0: i32) -> (i32, i32, i32) {
    %c0_i32 = arith.constant 0 : i32
    %c0_i32_0 = arith.constant 0 : i32
    %c0_i32_1 = arith.constant 0 : i32
    return %arg0, %c0_i32, %c0_i32_0 : i32, i32, i32
  }
}

</mosaic_0001>

<bundles_post_ra>
// kernel: tpu_custom_call.1
= control target key start
LH: loop header
LB: loop body
LE: loop exit
PB: predicated region body
PF: predicated region fallthrough
CT: control target
= control target key end

     0   :  { %s1393_s0 = inlined_call_operand.hbm [shape: f32[3,7,128], index: 0, kind: input, shape index: {}]   ;;  %s1394_s1 = inlined_call_operand.hbm [shape: f32[3,1,7], index: 1, kind: input, shape index: {}]   ;;  %s1395_s2 = inlined_call_operand.vmem [shape: f32[1,128], index: 2, kind: input, shape index: {}]   ;;  %s1396_s3 = inlined_call_operand.vmem [shape: f32[1,128], index: 3, kind: input, shape index: {}]   ;;  %s1397_s4 = inlined_call_operand.hbm [shape: bf16[128,128], index: 4, kind: input, shape index: {}]   ;;  %s1398_s5 = inlined_call_operand.vmem [shape: f32[1,128], index: 5, kind: input, shape index: {}]   ;;  %s1399_s6 = inlined_call_operand.hbm [shape: bf16[3,7,128], index: 6, kind: output, shape index: {0}]   ;;  %s1400_s7 = inlined_call_operand.hbm [shape: bf16[3,7,128], index: 7, kind: output, shape index: {1}]   ;;  %s1401_s8 = inlined_call_operand.hbm [shape: f32[3,1,7], index: 8, kind: output, shape index: {2}]  }
   0x1   :  { %1410 = sst [smem:[#allocation23_spill]] %s1397_s4 }
   0x2   :  { %14 = vsyncpa [#allocation3], 0 }
   0x3   :  { %16 = vsyncpa [#allocation3 + $0x1], 0 }
   0x4   :  { %17 = vsyncpa [#allocation6], 0 }
   0x5   :  { %19 = vsyncpa [#allocation6 + $0x1], 0 }
   0x6   :  { %20 = vsyncpa [#allocation4], 0 }
   0x7   :  { %22 = vsyncpa [#allocation4 + $0x1], 0 }
   0x8   :  { %23 = vsyncpa [#allocation10], 0 }
   0x9   :  { %25 = vsyncpa [#allocation10 + $0x1], 0  ;;  %s1153_s27 = smov 0   ;;  %s1155_s28 = smov 0  }
   0xa   :  { %s1157_s29 = smov 0   ;;  %s1159_s30 = smov 0  }
   0xb LB: > { %1411 = sst [smem:[#allocation17_spill]] %s1089_s27  ;;  %s1177_s12 = sadd.s32 4294967295, %s1101_s30   ;;  %s1101_s30 = sphi %s1159_s30, %s1430_s30   ;;  %s1097_s29 = sphi %s1157_s29, %s1432_s29   ;;  %s1093_s28 = sphi %s1155_s28, %s1434_s28   ;;  %s1089_s27 = sphi %s1153_s27, %s1433_s27  }
   0xc   : > { %1412 = sst [smem:[#allocation18_spill]] %s1097_s29  ;;  %p738_p0 = scmp.ge.s32.totalorder %s1101_s30, 1 }
   0xd   : > { %1413 = sst [smem:[#allocation19_spill]] %s1101_s30  ;;  %p52_p1 = scmp.eq.s32.totalorder %s1177_s12, 0 }
   0xe   : > { %s1414_s4 = sld [smem:[#allocation23_spill]]  ;;  %p250_p2 = scmp.lt.s32.totalorder %s1101_s30, 4 }
   0xf   : > { %s1103_s14 = smov [#allocation7]   ;;  %s1104_s16 = smov 64  }
  0x10   : > { %p1182_p3 = pnand %p738_p0, %p250_p2  ;;  %s269_s15 = sshll.u32 %s1103_s14, 4  ;;  %s270_s15 = int_to_ptr.vmem [resolvable:$true] %s269_s15 }
  0x11   : > { %s1105_s17 = smov 4   ;;  %s1402_s18 = sadd.s32 4294967294, %s1101_s30  }
  0x12   : > { %p808_p4 = pneg %p1182_p3  ;;  %s1192_s19 = sadd.s32 1, %s1101_s30  }
  0x13   : > { %1416 = sst [smem:[#allocation20_spill]] %s1192_s19  ;;  %s38_s20 = sadd.s32 1, %s1097_s29 }
  0x14   : > { %s267_s11 = sshll.u32 %s1414_s4, 4  ;;  %p809_p5 = pnand %p808_p4, %p52_p1  ;;  %s268_s11 = int_to_ptr.hbm [resolvable:$true] %s267_s11 }
  0x15   : > { %s35_s21 = ssub.s32 %s1101_s30, %s1192_s19  ;;  %p45_p6 = scmp.ne.s32.totalorder %s1097_s29, %s1093_s28 }
  0x16   : > { %811 = dma.hbm_to_vmem [thread:$0]  (!%p809_p5), %s268_s11, 1024, %s270_s15, [#allocation6], %s1104_s16, %s1104_s16, %s1105_s17  }
  0x17   : > { %p36_p7 = scmp.eq.s32.totalorder %s35_s21, 0  ;;  %p46_p8 = scmp.eq.s32.totalorder %s1101_s30, 0 }
  0x18   : > { %p51_p9 = scmp.ne.s32.totalorder %s1093_s28, %s1089_s27  ;;  %p185_p10 = scmp.eq.s32.totalorder %s1177_s12, 2 }
  0x19   : > { %s1204_s22 = scalar_select %p36_p7, %s1097_s29, %s38_s20  }
  0x1a   : > { %p1206_p11 = por %p46_p8, %p45_p6  ;;  %p1212_p12 = por %p52_p1, %p51_p9 }
  0x1b   : > { %1417 = sst [smem:[#allocation21_spill]] %s1204_s22  ;;  %p1216_p13 = por %p185_p10, %p45_p6 }
  0x1c   : > { %p191_p0 = scmp.eq.s32.totalorder %s1402_s18, 2  ;;  %p830_p2 = scmp.lt.s32.totalorder %s1101_s30, 3 }
  0x1d   : > { %s1224_s26 = sand.u32 1, %s1097_s29   ;;  %s742_s11 = sshll.u32 %s1101_s30, 3 }
  0x1e   : > { %p1226_p4 = por %p191_p0, %p51_p9  ;;  %s741_s10 = sshll.u32 %s1224_s26, 3 }
  0x1f   : > { %s294_s16 = scalar_lea.hbm %s1393_s0, %s742_s11  ;;  %s290_s20 = scalar_lea.vmem [#allocation2], %s741_s10 }
  0x20   : > { %s1421_s9 = scalar_select %p1226_p4, 1, 0 }
  0x21   : > { %s296_s17 = sshll.u32 %s294_s16, 4  ;;  %s298_s21 = sshll.u32 %s290_s20, 4  ;;  %s297_s17 = int_to_ptr.hbm [resolvable:$true] %s296_s17  ;;  %s299_s21 = int_to_ptr.vmem [resolvable:$true] %s298_s21 }
  0x22   : > { %1422 = sst [smem:[#allocation22_spill]] %s1421_s9  ;;  %p1237_p5 = pnand %p830_p2, %p1206_p11 }
  0x23   : > { %s305_s4 = sand.u32 1, %s1101_s30   ;;  %s311_s19 = scalar_lea.hbm %s1394_s1, %s1101_s30 }
  0x24   : > { %s287_s9 = scalar_lea.sflag [#allocation3], %s1224_s26  ;;  %s907_s14 = sshra.s32 %s297_s17, 4  ;;  %s908_s14 = int_to_ptr.hbm [resolvable:$true] %s907_s14 }
  0x25   : > { %s909_s11 = scalar_lea.hbm %s908_s14, 8  ;;  %p911_p7 = pneg %p1237_p5 }
  0x26   : > { %p910_p6 = scmp.ne.s32.totalorder %s908_s14, %s909_s11  ;;  %s914_s15 = scalar_lea.hbm %s1393_s0, 24 }
  0x27   : > { %p915_p10 = scmp.lt.s32.totalorder %s908_s14, %s1393_s0  ;;  %p916_p11 = scmp.lt.s32.totalorder %s914_s15, %s909_s11 }
  0x28   : > { %p912_p8 = pnand %p911_p7, %p910_p6 }
  0x29   : > { %p917_p0 = por %p916_p11, %p915_p10 }
  0x2a   : > { %p913_p9 = pneg %p912_p8 }
  0x2c   : > { %p918_p2 = pnand %p917_p0, %p913_p9 }
  0x2e   : > { %921 = shalt.err (!%p918_p2)
}
  0x2f   : > { %815 = dma.hbm_to_vmem [thread:$0]  (!%p1237_p5), %s297_s17, 128, %s299_s21, %s287_s9  }
  0x30   : > { %s313_s29 = sshll.u32 %s311_s19, 4  ;;  %s308_s22 = scalar_lea.vmem [#allocation5], %s1224_s26  ;;  %s314_s29 = int_to_ptr.hbm [resolvable:$true] %s313_s29 }
  0x31   : > { %s315_s27 = sshll.u32 %s308_s22, 4  ;;  %s306_s23 = scalar_lea.sflag [#allocation6], %s305_s4  ;;  %s316_s27 = int_to_ptr.vmem [resolvable:$true] %s315_s27 }
  0x32   : > { %s937_s10 = sshra.s32 %s314_s29, 4  ;;  %s944_s15 = scalar_lea.hbm %s1394_s1, 3  ;;  %s938_s10 = int_to_ptr.hbm [resolvable:$true] %s937_s10 }
  0x33   : > { %s939_s30 = scalar_lea.hbm %s938_s10, 1  ;;  %p945_p10 = scmp.lt.s32.totalorder %s938_s10, %s1394_s1 }
  0x34   : > { %p940_p6 = scmp.ne.s32.totalorder %s938_s10, %s939_s30  ;;  %p946_p11 = scmp.lt.s32.totalorder %s944_s15, %s939_s30 }
  0x36   : > { %p942_p8 = pnand %p940_p6, %p911_p7  ;;  %p947_p0 = por %p946_p11, %p945_p10 }
  0x38   : > { %p943_p9 = pneg %p942_p8 }
  0x3a   : > { %p948_p2 = pnand %p947_p0, %p943_p9 }
  0x3c   : > { %951 = shalt.err (!%p948_p2)
}
  0x3d   : > { %818 = dma.hbm_to_vmem [thread:$0]  (!%p1237_p5), %s314_s29, 16, %s316_s27, %s306_s23  }
  0x3e   : > { %324 = sbr.rel (%p1182_p3) target bundleno = 478 (0x1de), region = 44  ;;  %s1275_s4 = sand.u32 (!%p1182_p3), 1, %s1093_s28  }
  0x3f   : > { %s744_s19 = sshll.u32 (!%p1182_p3), %s1275_s4, 3  ;;  %s327_s26 = scalar_lea.sflag (!%p1182_p3), [#allocation3], %s1275_s4 }
  0x40   : > { %s330_s17 = scalar_lea.vmem (!%p1182_p3), [#allocation2], %s744_s19 }
  0x43   : > { %1068 = dma.done.wait (%p1212_p12), %s327_s26, 128  }
  0x44   : > { %1070 = vsyncadd (%p1212_p12), %s327_s26, 4294967168  ;;  %s336_s27 = sand.u32 1, %s1177_s12   ;;  %s339_s13 = scalar_lea.vmem [#allocation5], %s1275_s4 }
  0x45   : > { %s337_s30 = scalar_lea.sflag [#allocation6], %s336_s27 }
  0x46   : > { %1072 = dma.done.wait (%p1212_p12), %s337_s30, 16  }
  0x47   : > { %1074 = vsyncadd (%p1212_p12), %s337_s30, 4294967280 }
  0x48   : > { %1076 = dma.done.wait (%p52_p1), [#allocation6], 1024  }
  0x49   : > { %1078 = vsyncadd (%p52_p1), [#allocation6], 4294966272  ;;  %vm394_vm0 = vcmask 1046528   ;;  %v393_v0 = vld [vmem:[%s330_s17] sm:$0x7f]  ;;  %v1106_v2 = vmov 128.0  }
  0x4a   : > { %v395_v1 = vsel %vm394_vm0, %v393_v0, 0.0  ;;  %873 = vrcp.f32 %v1106_v2  ;;  %v793_v3 = vld [vmem:[#allocation7 + $0x38] sm:$0xff]  ;;  %v792_v15 = vld [vmem:[#allocation7 + $0x30] sm:$0xff]  ;;  %v791_v16 = vld [vmem:[#allocation7 + $0x28] sm:$0xff]  ;;  %s746_s21 = sshll.u32 %s1275_s4, 2  ;;  %vm515_vm5 = vcmask 1043456  }
  0x4b   : > { %396 = vadd.xlane.f32.xlu0 %v395_v1  ;;  %501 = vmatpush.bf16.msra.mxu0 %v793_v3  ;;  %v790_v17 = vld [vmem:[#allocation7 + $0x20] sm:$0xff]  ;;  %v789_v18 = vld [vmem:[#allocation7 + $0x18] sm:$0xff]  ;;  %v788_v19 = vld [vmem:[#allocation7 + $0x10] sm:$0xff]  ;;  %vm516_vm6 = vsmask.f32 3328  ;;  %s384_s22 = scalar_lea.vmem [#allocation9], %s746_s21 }
  0x4c   : > { %v787_v20 = vld [vmem:[#allocation7 + $0x8] sm:$0xff]  ;;  %v786_v21 = vld [vmem:[#allocation7] sm:$0xff]  ;;  %vm1304_vm7 = vmand %vm515_vm5, %vm516_vm6  ;;  %s782_s23 = sshll.u32 %s1177_s12, 2  ;;  %s565_s15 = sshll.u32 %s384_s22, 4  ;;  %s566_s15 = int_to_ptr.vmem [resolvable:$true] %s565_s15 }
  0x4d   : > { %v870_v31 = vld [vmem:[%s1395_s2] ss:$0 sm:$0xff]  ;;  %s563_s11 = scalar_lea.hbm %s1400_s7, %s782_s23  ;;  %s1320_s9 = scalar_lea.sflag [#allocation10], %s336_s27 }
  0x4e   : > { %v871_v34 = vld [vmem:[%s1396_s3] ss:$0 sm:$0xff]  ;;  %s567_s16 = sshll.u32 %s563_s11, 4  ;;  %s987_s18 = scalar_lea.hbm %s1400_s7, 12  ;;  %s568_s16 = int_to_ptr.hbm [resolvable:$true] %s567_s16 }
  0x4f   : > { %502 = vmatpush.bf16.msra.mxu0 %v792_v15  ;;  %v521_v38 = vld [vmem:[%s384_s22] sm:$0xf]  ;;  %s981_s19 = sshra.s32 %s568_s16, 4  ;;  %s982_s19 = int_to_ptr.hbm [resolvable:$true] %s981_s19 }
  0x50   : > { %v874_v4 = vpop.eup %873  ;;  %s983_s26 = scalar_lea.hbm %s982_s19, 4  ;;  %p988_p5 = scmp.lt.s32.totalorder %s982_s19, %s1400_s7 }
  0x51   : > { %v399_v5 = vmul.f32 128.0, %v874_v4  ;;  %vm403_vm1 = vweird.f32 %v874_v4  ;;  %p984_p1 = scmp.ne.s32.totalorder %s982_s19, %s983_s26  ;;  %p989_p7 = scmp.lt.s32.totalorder %s987_s18, %s983_s26 }
  0x53   : > { %v400_v6 = vsub.f32 1.0, %v399_v5  ;;  %503 = vmatpush.bf16.msra.mxu0 %v791_v16  ;;  %p985_p3 = pnand %p984_p1, %p1216_p13  ;;  %p990_p6 = por %p989_p7, %p988_p5 }
  0x55   : > { %v401_v7 = vmul.f32 %v874_v4, %v400_v6  ;;  %p986_p12 = pneg %p985_p3 }
  0x57   : > { %v402_v8 = vadd.f32 %v874_v4, %v401_v7  ;;  %504 = vmatpush.bf16.msra.mxu0 %v790_v17  ;;  %p991_p8 = pnand %p990_p6, %p986_p12 }
  0x59   : > { %v404_v9 = vsel %vm403_vm1, %v874_v4, %v402_v8 }
  0x5b   : > { %505 = vmatpush.bf16.msra.mxu0 %v789_v18 }
  0x5f   : > { %506 = vmatpush.bf16.msra.mxu0 %v788_v19 }
  0x63   : > { %507 = vmatpush.bf16.msra.mxu0 %v787_v20 }
  0x67   : > { %508 = vmatpush.bf16.msra.mxu0 %v786_v21 }
  0xbe   : > { %v397_v10 = vpop.xlane.xlu0 %396 }
  0xbf   : > { %v405_v11 = vmul.f32 %v404_v9, %v397_v10 }
  0xc1   : > { %v406_v12 = vsub.f32 %v393_v0, %v405_v11 }
  0xc3   : > { %v407_v13 = vmul.f32 %v406_v12, %v406_v12 }
  0xc5   : > { %v408_v14 = vsel %vm394_vm0, %v407_v13, 0.0 }
  0xc6   : > { %409 = vadd.xlane.f32.xlu0 %v408_v14 }
 0x139   : > { %v410_v22 = vpop.xlane.xlu0 %409 }
 0x13a   : > { %v411_v23 = vmul.f32 %v410_v22, %v404_v9 }
 0x13c   : > { %v412_v24 = vadd.f32 1e-05, %v411_v23 }
 0x13e   : > { %875 = vrsqrt.f32 %v412_v24  ;;  %vm419_vm3 = vweird.f32 %v412_v24 }
 0x144   : > { %v876_v25 = vpop.eup %875 }
 0x145   : > { %v414_v26 = vmul.f32 %v876_v25, %v412_v24  ;;  %vm420_vm2 = vweird.f32 %v876_v25 }
 0x146   : > { %vm421_vm4 = vmor %vm419_vm3, %vm420_vm2 }
 0x147   : > { %v415_v27 = vmul.f32 %v876_v25, %v414_v26 }
 0x149   : > { %v416_v28 = vmul.f32 0.5, %v415_v27 }
 0x14b   : > { %v417_v29 = vsub.f32 1.5, %v416_v28 }
 0x14d   : > { %v418_v30 = vmul.f32 %v876_v25, %v417_v29 }
 0x14f   : > { %v422_v32 = vsel %vm421_vm4, %v876_v25, %v418_v30 }
 0x150   : > { %v423_v33 = vmul.f32 %v422_v32, %v406_v12 }
 0x152   : > { %v427_v35 = vmul.f32 %v870_v31, %v423_v33 }
 0x154   : > { %v431_v36 = vadd.f32 %v871_v34, %v427_v35 }
 0x156   : > { %v432_v39 = vpack.c.bf16 %v431_v36, %v431_v36 }
 0x158   : > { %509 = vmatmul.bf16.vlgmr.msra.gmra.mxu0 %v432_v39  ;;  %v522_v40 = vsel %vm1304_vm7, %v432_v39, %v521_v38 }
 0x159   : > { %523 = vst [vmem:[%s384_s22] sm:$0xf] %v522_v40 }
 0x15a   : > { %994 = shalt.err (!%p991_p8)
}
 0x15b   : > { %803 = dma.vmem_to_hbm [thread:$0]  (%p1216_p13), %s566_s15, 64, %s568_s16, %s1320_s9   ;;  %v524_v41 = vld [vmem:[%s339_s13] sm:$0x1]  ;;  %v1107_v42 = vmov -1e+30   ;;  %vm527_vm9 = vcmask 49152  }
 0x15c   : > { %s576_s22 = scalar_lea.hbm %s1401_s8, %s1177_s12  ;;  %s390_s10 = scalar_lea.vmem [#allocation11], %s1275_s4  ;;  %vm525_vm8 = vcmp.gt.f32.partialorder %v524_v41, 0.0 }
 0x15d   : > { %s578_s14 = sshll.u32 %s390_s10, 4  ;;  %s580_s11 = sshll.u32 %s576_s22, 4  ;;  %v526_v43 = vsel %vm525_vm8, 0.0, %v1107_v42  ;;  %s579_s14 = int_to_ptr.vmem [resolvable:$true] %s578_s14  ;;  %s581_s11 = int_to_ptr.hbm [resolvable:$true] %s580_s11 }
 0x15e   : > { %528 = vst.msk [vmem:[%s390_s10] sm:$0x1] %vm527_vm9, %v526_v43  ;;  %s1009_s19 = sshra.s32 %s581_s11, 4  ;;  %s1015_s17 = scalar_lea.hbm %s1401_s8, 3  ;;  %s1010_s19 = int_to_ptr.hbm [resolvable:$true] %s1009_s19 }
 0x15f   : > { %s1011_s15 = scalar_lea.hbm %s1010_s19, 1  ;;  %p1016_p0 = scmp.lt.s32.totalorder %s1010_s19, %s1401_s8 }
 0x160   : > { %p1012_p9 = scmp.ne.s32.totalorder %s1010_s19, %s1011_s15  ;;  %p1017_p2 = scmp.lt.s32.totalorder %s1015_s17, %s1011_s15 }
 0x162   : > { %p1013_p10 = pnand %p1012_p9, %p1216_p13  ;;  %p1018_p1 = por %p1017_p2, %p1016_p0 }
 0x164   : > { %p1014_p11 = pneg %p1013_p10 }
 0x166   : > { %p1019_p3 = pnand %p1018_p1, %p1014_p11 }
 0x168   : > { %1022 = shalt.err (!%p1019_p3)
}
 0x169   : > { %804 = dma.vmem_to_hbm [thread:$0]  (%p1216_p13), %s579_s14, 16, %s581_s11, %s1320_s9   ;;  %v872_v44 = vld [vmem:[%s1398_s5] ss:$0 sm:$0xff] }
 0x16a   : > { %s549_s29 = scalar_lea.hbm %s1399_s6, %s782_s23  ;;  %s377_s22 = scalar_lea.vmem [#allocation8], %s746_s21 }
 0x16b   : > { %s551_s10 = sshll.u32 %s377_s22, 4  ;;  %s553_s19 = sshll.u32 %s549_s29, 4  ;;  %v518_v47 = vld [vmem:[%s377_s22] sm:$0xf]  ;;  %s552_s10 = int_to_ptr.vmem [resolvable:$true] %s551_s10  ;;  %s554_s19 = int_to_ptr.hbm [resolvable:$true] %s553_s19 }
 0x16c   : > { %s530_s12 = scalar_lea.sflag [#allocation4], %s1275_s4  ;;  %s1037_s9 = sshra.s32 %s554_s19, 4  ;;  %s1038_s9 = int_to_ptr.hbm [resolvable:$true] %s1037_s9 }
 0x16d   : > { %s1039_s14 = scalar_lea.hbm %s1038_s9, 4  ;;  %s1043_s11 = scalar_lea.hbm %s1399_s6, 12 }
 0x16e   : > { %p1040_p12 = scmp.ne.s32.totalorder %s1038_s9, %s1039_s14  ;;  %p1044_p6 = scmp.lt.s32.totalorder %s1038_s9, %s1399_s6 }
 0x16f   : > { %p1045_p8 = scmp.lt.s32.totalorder %s1043_s11, %s1039_s14 }
 0x170   : > { %p1041_p5 = pnand %p1040_p12, %p1216_p13 }
 0x171   : > { %p1046_p9 = por %p1045_p8, %p1044_p6 }
 0x172   : > { %p1042_p7 = pneg %p1041_p5 }
 0x174   : > { %p1047_p10 = pnand %p1046_p9, %p1042_p7 }
 0x1d5   : > { %v510_v45 = vpop.f32.mrf.mxu0 }
 0x1d6   : > { %v511_v46 = vadd.f32 %v872_v44, %v510_v45 }
 0x1d8   : > { %v514_v48 = vpack.c.bf16 %v511_v46, %v511_v46 }
 0x1da   : > { %v519_v49 = vsel %vm1304_vm7, %v514_v48, %v518_v47 }
 0x1db   : > { %520 = vst [vmem:[%s377_s22] sm:$0xf] %v519_v49 }
 0x1dc   : > { %1050 = shalt.err (!%p1047_p10)
}
 0x1dd   : > { %802 = dma.vmem_to_hbm [thread:$0]  (%p1216_p13), %s552_s10, 64, %s554_s19, %s530_s12   ;;  %v512_v50 = vpop.f32.mrf.mxu0 }
 0x1de PF: > { %s1426_s4 = sld [smem:[#allocation19_spill]] }
 0x1df   : > { %s1427_s26 = sld [smem:[#allocation17_spill]] }
 0x1e4   : > { %p832_p11 = scmp.ge.s32.totalorder %s1426_s4, 2 }
 0x1e5   : > { %s592_s30 = sand.u32 1, %s1427_s26  }
 0x1e6   : > { %p820_p0 = pnand %p832_p11, %p1226_p4  ;;  %s593_s13 = scalar_lea.sflag [#allocation4], %s592_s30 }
 0x1e8   : > { %p821_p2 = pneg %p820_p0 }
 0x1ea   : > { %1080 = dma.done.wait (%p821_p2), %s593_s13, 64  }
 0x1eb   : > { %1082 = vsyncadd (%p821_p2), %s593_s13, 4294967232  ;;  %s1429_s18 = sadd.s32 4294967294, %s1426_s4  }
 0x1ec   : > { %s602_s24 = sand.u32 1, %s1429_s18  }
 0x1ed   : > { %s603_s20 = scalar_lea.sflag [#allocation10], %s602_s24 }
 0x1ee   : > { %1084 = dma.done.wait (%p821_p2), %s603_s20, 80  }
 0x1ef   : > { %1086 = vsyncadd (%p821_p2), %s603_s20, 4294967216  ;;  %s1430_s30 = sld [smem:[#allocation20_spill]]  ;;  %s1433_s27 = smov %s1093_s28 }
 0x1f0   : > { %s1431_s25 = sld [smem:[#allocation18_spill]] }
 0x1f1   : > { %s1432_s29 = sld [smem:[#allocation21_spill]] }
 0x1f5   : > { %p28_p13 = scmp.ge.s32.totalorder %s1430_s30, 5  }
 0x1f6   : > { %s1434_s28 = smov %s1431_s25 }
 0x1f7   :  { %30 = sbr.rel (!%p28_p13) target bundleno = 11 (0xb), region = 138 }
 0x1fc   :  { %618 = vsyncpa [#allocation3], 1 }
 0x1fd   :  { %620 = vsyncpa [#allocation3 + $0x1], 1 }
 0x1fe   :  { %621 = vsyncpa [#allocation6], 1 }
 0x1ff   :  { %623 = vsyncpa [#allocation6 + $0x1], 1 }
 0x200   :  { %624 = vsyncpa [#allocation4], 1 }
 0x201   :  { %626 = vsyncpa [#allocation4 + $0x1], 1 }
 0x202   :  { %627 = vsyncpa [#allocation10], 1 }
 0x203   :  { %629 = vsyncpa [#allocation10 + $0x1], 1 }

</bundles_post_ra>
